<compile_context>
chip_gen: v7x
topology: tpu7x:2x2x1
jax: 0.10.0
libtpu: 0.0.40
codegen_flags: <defaults>
</compile_context>

<pallas_src>
import functools

import jax
import jax.numpy as jnp
from jax import lax
from jax.experimental import pallas as pl
from jax.experimental.pallas import tpu as pltpu


def _round_up(a, b):
    return (a + b - 1) // b * b


def _conv_embed_kernel(p_ref, w_ref, b_ref, g_ref, beta_ref, o_ref, *,
                       eps, c_real):
    # p_ref: (TM, K_pad) bf16 im2col patch rows
    # w_ref: (K_pad, C_pad) bf16 flattened conv weights
    # b_ref, g_ref, beta_ref: (1, C_pad) f32 conv bias / LN gamma / LN beta
    # o_ref: (TM, C_pad)
    acc = jnp.dot(p_ref[...], w_ref[...], preferred_element_type=jnp.float32)
    acc = acc + b_ref[...]          # conv bias; padded columns stay exactly 0

    # LayerNorm over the *real* embed_dim (padded columns of acc are zero).
    inv_c = jnp.float32(1.0 / c_real)
    mean = jnp.sum(acc, axis=-1, keepdims=True) * inv_c
    centered = acc - mean
    c_pad = acc.shape[-1]
    if c_pad != c_real:
        col = lax.broadcasted_iota(jnp.int32, acc.shape, dimension=1)
        centered = jnp.where(col < c_real, centered, 0.0)
    var = jnp.sum(centered * centered, axis=-1, keepdims=True) * inv_c
    y = centered * lax.rsqrt(var + eps)
    o_ref[...] = (y * g_ref[...] + beta_ref[...]).astype(o_ref.dtype)


def conv_embedding_forward(x, conv_w, conv_b, ln_g, ln_b,
                           *, patch_size=7, stride=4, eps=1e-5, tm=2048):
    """x: (B, C_in, H, W) NCHW.  Returns (out, H_out, W_out) with
    out: (B, H_out*W_out, embed_dim)."""
    B, Cin, H, W = x.shape
    kh = kw = patch_size
    pad = patch_size // 2
    Hout = (H + 2 * pad - kh) // stride + 1
    Wout = (W + 2 * pad - kw) // stride + 1
    embed_dim = conv_w.shape[0]
    K = Cin * kh * kw
    M = B * Hout * Wout

    # ---- im2col as a single fused XLA op; feature order = (Cin, kh, kw) ----
    patches = lax.conv_general_dilated_patches(
        x, filter_shape=(kh, kw), window_strides=(stride, stride),
        padding=((pad, pad), (pad, pad)),
        dimension_numbers=("NCHW", "OIHW", "NCHW"))        # (B, K, Hout, Wout)
    patches = patches.transpose(0, 2, 3, 1).reshape(M, K)  # (M, K)

    # ---- pad to TPU-friendly (lane/sublane aligned) shapes ----
    K_pad = _round_up(K, 128)
    C_pad = _round_up(embed_dim, 128)
    if M < tm:
        tm = max(_round_up(M, 16), 16)
    M_pad = _round_up(M, tm)

    patches = jnp.pad(patches.astype(jnp.bfloat16),
                      ((0, M_pad - M), (0, K_pad - K)))
    w_mat = conv_w.reshape(embed_dim, K).T.astype(jnp.bfloat16)
    w_mat = jnp.pad(w_mat, ((0, K_pad - K), (0, C_pad - embed_dim)))
    b_row = jnp.pad(conv_b.astype(jnp.float32).reshape(1, embed_dim),
                    ((0, 0), (0, C_pad - embed_dim)))
    g_row = jnp.pad(ln_g.astype(jnp.float32).reshape(1, embed_dim),
                    ((0, 0), (0, C_pad - embed_dim)))
    beta_row = jnp.pad(ln_b.astype(jnp.float32).reshape(1, embed_dim),
                       ((0, 0), (0, C_pad - embed_dim)))

    out = pl.pallas_call(
        functools.partial(_conv_embed_kernel, eps=eps, c_real=embed_dim),
        out_shape=jax.ShapeDtypeStruct((M_pad, C_pad), x.dtype),
        grid=(M_pad // tm,),
        in_specs=[
            pl.BlockSpec((tm, K_pad), lambda i: (i, 0)),
            pl.BlockSpec((K_pad, C_pad), lambda i: (0, 0)),
            pl.BlockSpec((1, C_pad), lambda i: (0, 0)),
            pl.BlockSpec((1, C_pad), lambda i: (0, 0)),
            pl.BlockSpec((1, C_pad), lambda i: (0, 0)),
        ],
        out_specs=pl.BlockSpec((tm, C_pad), lambda i: (i, 0)),
        compiler_params=pltpu.CompilerParams(
            dimension_semantics=("parallel",),
            vmem_limit_bytes=64 * 1024 * 1024),
    )(patches, w_mat, b_row, g_row, beta_row)

    out = out[:M, :embed_dim].reshape(B, Hout * Wout, embed_dim)
    return out, Hout, Wout


if __name__ == "__main__":
    # Small shapes consistent with the module: patch_size=7, stride=4,
    # in_chans=3, embed_dim=64, input 2x3x16x16 -> H_out=W_out=4.
    B, Cin, H, W = 2, 3, 16, 16
    patch_size, stride, embed_dim = 7, 4, 64
    eps = 1e-5

    key = jax.random.PRNGKey(0)
    kx, kwt, kb, kg, kbeta = jax.random.split(key, 5)

    x = jax.random.normal(kx, (B, Cin, H, W), dtype=jnp.float32)
    conv_w = jax.random.normal(kwt, (embed_dim, Cin, patch_size, patch_size),
                               dtype=jnp.float32) * 0.05
    conv_b = jax.random.normal(kb, (embed_dim,), dtype=jnp.float32) * 0.05
    ln_g = jnp.ones((embed_dim,), jnp.float32) + 0.01 * jax.random.normal(
        kg, (embed_dim,), dtype=jnp.float32)
    ln_b = 0.01 * jax.random.normal(kbeta, (embed_dim,), dtype=jnp.float32)

    out, Hout, Wout = conv_embedding_forward(
        x, conv_w, conv_b, ln_g, ln_b,
        patch_size=patch_size, stride=stride, eps=eps)
    out = jax.block_until_ready(out)
    assert out.shape == (B, Hout * Wout, embed_dim), out.shape

    # Reference: plain-JAX conv (same bf16 MXU inputs) + LayerNorm, f32 math.
    pad = patch_size // 2
    conv_ref = lax.conv_general_dilated(
        x.astype(jnp.bfloat16), conv_w.astype(jnp.bfloat16),
        window_strides=(stride, stride),
        padding=((pad, pad), (pad, pad)),
        dimension_numbers=("NCHW", "OIHW", "NCHW"),
        preferred_element_type=jnp.float32)                # (B, C, Hout, Wout)
    ref = conv_ref.reshape(B, embed_dim, -1).transpose(0, 2, 1) + conv_b
    mean = ref.mean(-1, keepdims=True)
    var = ((ref - mean) ** 2).mean(-1, keepdims=True)
    ref = (ref - mean) * lax.rsqrt(var + eps) * ln_g + ln_b

    assert jnp.allclose(out, ref, atol=5e-2, rtol=5e-2), \
        float(jnp.max(jnp.abs(out - ref)))
    print("KERNEL_OK")
</pallas_src>

<mosaic_0001>
module attributes {stable_mosaic.version = 11 : i64} {
  func.func @_conv_embed_kernel(%arg0: i32, %arg1: memref<32x256xbf16, #tpu.memory_space<vmem>>, %arg2: memref<256x128xbf16, #tpu.memory_space<vmem>>, %arg3: memref<1x128xf32, #tpu.memory_space<vmem>>, %arg4: memref<1x128xf32, #tpu.memory_space<vmem>>, %arg5: memref<1x128xf32, #tpu.memory_space<vmem>>, %arg6: memref<32x128xf32, #tpu.memory_space<vmem>>) attributes {dimension_semantics = [#tpu.dimension_semantics<parallel>], iteration_bounds = array<i64: 1>, scalar_prefetch = 0 : i64, scratch_operands = 0 : i64, tpu.core_type = #tpu.core_type<tc>, window_params = [{transform_indices = @transform_0, window_bounds = array<i64: 32, 256>}, {pipeline_mode = #tpu.pipeline_mode<synchronous>, transform_indices = @transform_1, window_bounds = array<i64: 256, 128>}, {pipeline_mode = #tpu.pipeline_mode<synchronous>, transform_indices = @transform_2, window_bounds = array<i64: 1, 128>}, {pipeline_mode = #tpu.pipeline_mode<synchronous>, transform_indices = @transform_3, window_bounds = array<i64: 1, 128>}, {pipeline_mode = #tpu.pipeline_mode<synchronous>, transform_indices = @transform_4, window_bounds = array<i64: 1, 128>}, {transform_indices = @transform_5, window_bounds = array<i64: 32, 128>}]} {
    %c0 = arith.constant 0 : index
    %c0_0 = arith.constant 0 : index
    %0 = vector.load %arg1[%c0, %c0_0] : memref<32x256xbf16, #tpu.memory_space<vmem>>, vector<32x256xbf16>
    %c0_1 = arith.constant 0 : index
    %c0_2 = arith.constant 0 : index
    %1 = vector.load %arg2[%c0_1, %c0_2] : memref<256x128xbf16, #tpu.memory_space<vmem>>, vector<256x128xbf16>
    %cst = arith.constant dense<0.000000e+00> : vector<32x128xf32>
    %2 = tpu.matmul %0, %1, %cst {dimension_numbers = #tpu.dot_dimension_numbers<[1], [0], [0], [1], [0, 0, 1, 1], [], []>} : vector<32x256xbf16>, vector<256x128xbf16>, vector<32x128xf32> -> vector<32x128xf32>
    %c0_3 = arith.constant 0 : index
    %c0_4 = arith.constant 0 : index
    %3 = vector.load %arg3[%c0_3, %c0_4] : memref<1x128xf32, #tpu.memory_space<vmem>>, vector<1x128xf32>
    %4 = vector.broadcast %3 : vector<1x128xf32> to vector<32x128xf32>
    %5 = arith.addf %2, %4 : vector<32x128xf32>
    %cst_5 = arith.constant dense<0.000000e+00> : vector<32xf32>
    %6 = vector.multi_reduction <add>, %5, %cst_5 [1] : vector<32x128xf32> to vector<32xf32>
    %7 = vector.shape_cast %6 : vector<32xf32> to vector<32x1xf32>
    %cst_6 = arith.constant 1.562500e-02 : f32
    %8 = vector.broadcast %cst_6 : f32 to vector<32x1xf32>
    %9 = arith.mulf %7, %8 : vector<32x1xf32>
    %10 = vector.broadcast %9 : vector<32x1xf32> to vector<32x128xf32>
    %11 = arith.subf %5, %10 : vector<32x128xf32>
    %12 = tpu.iota {dimensions = array<i32: 1>} : vector<32x128xi32>
    %c64_i32 = arith.constant 64 : i32
    %13 = vector.broadcast %c64_i32 : i32 to vector<32x128xi32>
    %14 = arith.cmpi slt, %12, %13 : vector<32x128xi32>
    %cst_7 = arith.constant 0.000000e+00 : f32
    %15 = vector.broadcast %cst_7 : f32 to vector<32x128xf32>
    %16 = arith.select %14, %11, %15 : vector<32x128xi1>, vector<32x128xf32>
    %17 = arith.mulf %16, %16 : vector<32x128xf32>
    %cst_8 = arith.constant dense<0.000000e+00> : vector<32xf32>
    %18 = vector.multi_reduction <add>, %17, %cst_8 [1] : vector<32x128xf32> to vector<32xf32>
    %19 = vector.shape_cast %18 : vector<32xf32> to vector<32x1xf32>
    %cst_9 = arith.constant 1.562500e-02 : f32
    %20 = vector.broadcast %cst_9 : f32 to vector<32x1xf32>
    %21 = arith.mulf %19, %20 : vector<32x1xf32>
    %cst_10 = arith.constant 9.99999974E-6 : f32
    %22 = vector.broadcast %cst_10 : f32 to vector<32x1xf32>
    %23 = arith.addf %21, %22 : vector<32x1xf32>
    %24 = math.rsqrt %23 : vector<32x1xf32>
    %25 = vector.broadcast %24 : vector<32x1xf32> to vector<32x128xf32>
    %26 = arith.mulf %16, %25 : vector<32x128xf32>
    %c0_11 = arith.constant 0 : index
    %c0_12 = arith.constant 0 : index
    %27 = vector.load %arg4[%c0_11, %c0_12] : memref<1x128xf32, #tpu.memory_space<vmem>>, vector<1x128xf32>
    %28 = vector.broadcast %27 : vector<1x128xf32> to vector<32x128xf32>
    %29 = arith.mulf %26, %28 : vector<32x128xf32>
    %c0_13 = arith.constant 0 : index
    %c0_14 = arith.constant 0 : index
    %30 = vector.load %arg5[%c0_13, %c0_14] : memref<1x128xf32, #tpu.memory_space<vmem>>, vector<1x128xf32>
    %31 = vector.broadcast %30 : vector<1x128xf32> to vector<32x128xf32>
    %32 = arith.addf %29, %31 : vector<32x128xf32>
    %c0_15 = arith.constant 0 : index
    %c0_16 = arith.constant 0 : index
    %33 = vector.load %arg6[%c0_15, %c0_16] : memref<32x128xf32, #tpu.memory_space<vmem>>, vector<32x128xf32>
    tpu.vector_store %arg6[%c0_15, %c0_16], %32 {strides = array<i32>} : memref<32x128xf32, #tpu.memory_space<vmem>>, vector<32x128xf32>,
    return
  }
  func.func @transform_0(%arg0: i32) -> (i32, i32) {
    %c0_i32 = arith.constant 0 : i32
    %c0_i32_0 = arith.constant 0 : i32
    return %arg0, %c0_i32 : i32, i32
  }
  func.func @transform_1(%arg0: i32) -> (i32, i32) {
    %c0_i32 = arith.constant 0 : i32
    %c0_i32_0 = arith.constant 0 : i32
    %c0_i32_1 = arith.constant 0 : i32
    return %c0_i32, %c0_i32_0 : i32, i32
  }
  func.func @transform_2(%arg0: i32) -> (i32, i32) {
    %c0_i32 = arith.constant 0 : i32
    %c0_i32_0 = arith.constant 0 : i32
    %c0_i32_1 = arith.constant 0 : i32
    return %c0_i32, %c0_i32_0 : i32, i32
  }
  func.func @transform_3(%arg0: i32) -> (i32, i32) {
    %c0_i32 = arith.constant 0 : i32
    %c0_i32_0 = arith.constant 0 : i32
    %c0_i32_1 = arith.constant 0 : i32
    return %c0_i32, %c0_i32_0 : i32, i32
  }
  func.func @transform_4(%arg0: i32) -> (i32, i32) {
    %c0_i32 = arith.constant 0 : i32
    %c0_i32_0 = arith.constant 0 : i32
    %c0_i32_1 = arith.constant 0 : i32
    return %c0_i32, %c0_i32_0 : i32, i32
  }
  func.func @transform_5(%arg0: i32) -> (i32, i32) {
    %c0_i32 = arith.constant 0 : i32
    %c0_i32_0 = arith.constant 0 : i32
    return %arg0, %c0_i32 : i32, i32
  }
}

</mosaic_0001>

<bundles_post_ra>
// kernel: tpu_custom_call.1
= control target key start
LH: loop header
LB: loop body
LE: loop exit
PB: predicated region body
PF: predicated region fallthrough
CT: control target
= control target key end

     0   :  { %10 = vsyncpa [#allocation3], 0  ;;  %s757_s0 = inlined_call_operand.hbm [shape: bf16[32,256], index: 0, kind: input, shape index: {}]   ;;  %s758_s1 = inlined_call_operand.hbm [shape: bf16[256,128], index: 1, kind: input, shape index: {}]   ;;  %s759_s2 = inlined_call_operand.hbm [shape: f32[1,128], index: 2, kind: input, shape index: {}]   ;;  %s760_s3 = inlined_call_operand.hbm [shape: f32[1,128], index: 3, kind: input, shape index: {}]   ;;  %s761_s4 = inlined_call_operand.hbm [shape: f32[1,128], index: 4, kind: input, shape index: {}]   ;;  %s762_s5 = inlined_call_operand.hbm [shape: f32[32,128], index: 5, kind: output, shape index: {}]  }
   0x1   :  { %11 = vsyncpa [#allocation6], 0 }
   0x2   :  { %12 = vsyncpa [#allocation9], 0 }
   0x3   :  { %13 = vsyncpa [#allocation4], 0  ;;  %s635_s18 = smov [#allocation5]   ;;  %s495_s22 = scalar_lea.hbm %s758_s1, 2048 }
   0x4   :  { %s31_s19 = sshll.u32 %s635_s18, 4  ;;  %p496_p0 = scmp.ne.s32.totalorder %s758_s1, %s495_s22  ;;  %s32_s19 = int_to_ptr.vmem [resolvable:$true] %s31_s19 }
   0x5   :  { %p499_p1 = scmp.lt.u32.totalorder %s495_s22, %s758_s1 }
   0x7   :  { %p501_p2 = pnand %p499_p1, %p496_p0 }
   0x9   :  { %504 = shalt.err (!%p501_p2)
}
   0xa   :  { %s505_s27 = scalar_lea.vmem %s32_s19, 2048  ;;  %p510_p4 = scmp.lt.s32.totalorder %s32_s19, %s32_s19 }
   0xb   :  { %p506_p3 = scmp.ne.s32.totalorder %s32_s19, %s505_s27  ;;  %p511_p5 = scmp.lt.s32.totalorder %s505_s27, %s505_s27 }
   0xd   :  { %p512_p6 = por %p511_p5, %p510_p4 }
   0xf   :  { %p513_p7 = pnand %p512_p6, %p506_p3 }
  0x11   :  { %516 = shalt.err (!%p513_p7)
}
  0x12   :  { %s636_s28 = smov 64   ;;  %s637_s29 = smov 4  }
  0x13   :  { %37 = dma.hbm_to_vmem [thread:$0]  %s758_s1, 2048, %s32_s19, [#allocation6], %s636_s28, %s636_s28, %s637_s29  }
  0x14   :  { %s638_s7 = smov [#allocation8]   ;;  %s639_s9 = smov [#allocation2]  }
  0x15   :  { %s54_s8 = sshll.u32 %s638_s7, 4  ;;  %s19_s10 = sshll.u32 %s639_s9, 4  ;;  %s55_s8 = int_to_ptr.vmem [resolvable:$true] %s54_s8  ;;  %s20_s10 = int_to_ptr.vmem [resolvable:$true] %s19_s10 }
  0x16   :  { %s517_s13 = scalar_lea.hbm %s760_s3, 16 }
  0x17   :  { %p518_p8 = scmp.ne.s32.totalorder %s760_s3, %s517_s13  ;;  %p521_p9 = scmp.lt.u32.totalorder %s517_s13, %s760_s3 }
  0x19   :  { %p523_p10 = pnand %p521_p9, %p518_p8 }
  0x1b   :  { %526 = shalt.err (!%p523_p10)
}
  0x1c   :  { %s527_s1 = scalar_lea.vmem %s55_s8, 16  ;;  %s531_s18 = scalar_lea.vmem %s55_s8, 32 }
  0x1d   :  { %p528_p11 = scmp.ne.s32.totalorder %s55_s8, %s527_s1  ;;  %p532_p12 = scmp.lt.s32.totalorder %s55_s8, %s55_s8 }
  0x1e   :  { %p533_p13 = scmp.lt.s32.totalorder %s531_s18, %s527_s1 }
  0x20   :  { %p534_p0 = por %p533_p13, %p532_p12 }
  0x22   :  { %p535_p1 = pnand %p534_p0, %p528_p11 }
  0x24   :  { %538 = shalt.err (!%p535_p1)
}
  0x25   :  { %57 = dma.hbm_to_vmem [thread:$0]  %s760_s3, 16, %s55_s8, [#allocation9]  }
  0x26   :  { %s539_s23 = scalar_lea.hbm %s757_s0, 512 }
  0x27   :  { %p540_p2 = scmp.ne.s32.totalorder %s757_s0, %s539_s23  ;;  %p543_p3 = scmp.lt.u32.totalorder %s539_s23, %s757_s0 }
  0x29   :  { %p545_p4 = pnand %p543_p3, %p540_p2 }
  0x2b   :  { %548 = shalt.err (!%p545_p4)
}
  0x2c   :  { %s549_s28 = scalar_lea.vmem %s20_s10, 512  ;;  %p554_p6 = scmp.lt.s32.totalorder %s20_s10, %s20_s10 }
  0x2d   :  { %p550_p5 = scmp.ne.s32.totalorder %s20_s10, %s549_s28  ;;  %p555_p7 = scmp.lt.s32.totalorder %s549_s28, %s549_s28 }
  0x2f   :  { %p556_p8 = por %p555_p7, %p554_p6 }
  0x31   :  { %p557_p9 = pnand %p556_p8, %p550_p5 }
  0x33   :  { %560 = shalt.err (!%p557_p9)
}
  0x34   :  { %s640_s3 = smov 128   ;;  %s641_s29 = smov 8  }
  0x35   :  { %25 = dma.hbm_to_vmem [thread:$0]  %s757_s0, 512, %s20_s10, [#allocation3], %s640_s3, %s640_s3, %s641_s29  }
  0x36   :  { %s642_s7 = smov [#allocation7]   ;;  %s643_s9 = smov [#allocation10]  }
  0x37   :  { %s44_s8 = sshll.u32 %s642_s7, 4  ;;  %s64_s11 = sshll.u32 %s643_s9, 4  ;;  %s45_s8 = int_to_ptr.vmem [resolvable:$true] %s44_s8  ;;  %s65_s11 = int_to_ptr.vmem [resolvable:$true] %s64_s11 }
  0x38   :  { %s561_s14 = scalar_lea.hbm %s759_s2, 16 }
  0x39   :  { %p562_p10 = scmp.ne.s32.totalorder %s759_s2, %s561_s14  ;;  %p565_p11 = scmp.lt.u32.totalorder %s561_s14, %s759_s2 }
  0x3b   :  { %p567_p12 = pnand %p565_p11, %p562_p10 }
  0x3d   :  { %570 = shalt.err (!%p567_p12)
}
  0x3e   :  { %s571_s0 = scalar_lea.vmem %s45_s8, 16  ;;  %s575_s10 = scalar_lea.vmem %s45_s8, 32 }
  0x3f   :  { %p572_p13 = scmp.ne.s32.totalorder %s45_s8, %s571_s0  ;;  %p576_p0 = scmp.lt.s32.totalorder %s45_s8, %s45_s8 }
  0x40   :  { %p577_p1 = scmp.lt.s32.totalorder %s575_s10, %s571_s0 }
  0x42   :  { %p578_p2 = por %p577_p1, %p576_p0 }
  0x44   :  { %p579_p3 = pnand %p578_p2, %p572_p13 }
  0x46   :  { %582 = shalt.err (!%p579_p3)
}
  0x47   :  { %47 = dma.hbm_to_vmem [thread:$0]  %s759_s2, 16, %s45_s8, [#allocation6]  }
  0x48   :  { %s583_s22 = scalar_lea.hbm %s761_s4, 16 }
  0x49   :  { %p584_p4 = scmp.ne.s32.totalorder %s761_s4, %s583_s22  ;;  %p587_p5 = scmp.lt.u32.totalorder %s583_s22, %s761_s4 }
  0x4b   :  { %p589_p6 = pnand %p587_p5, %p584_p4 }
  0x4d   :  { %592 = shalt.err (!%p589_p6)
}
  0x4e   :  { %s593_s27 = scalar_lea.vmem %s65_s11, 16  ;;  %s597_s28 = scalar_lea.vmem %s65_s11, 32 }
  0x4f   :  { %p594_p7 = scmp.ne.s32.totalorder %s65_s11, %s593_s27  ;;  %p598_p8 = scmp.lt.s32.totalorder %s65_s11, %s65_s11 }
  0x50   :  { %p599_p9 = scmp.lt.s32.totalorder %s597_s28, %s593_s27 }
  0x52   :  { %p600_p10 = por %p599_p9, %p598_p8 }
  0x54   :  { %p601_p11 = pnand %p600_p10, %p594_p7 }
  0x56   :  { %604 = shalt.err (!%p601_p11)
}
  0x57   :  { %67 = dma.hbm_to_vmem [thread:$0]  %s761_s4, 16, %s65_s11, [#allocation9]  }
  0x58   :  { %627 = dma.done.wait [#allocation3], 512  }
  0x59   :  { %628 = vsyncadd [#allocation3], 4294966784 }
  0x5a   :  { %629 = dma.done.wait [#allocation6], 2064  }
  0x5b   :  { %630 = vsyncadd [#allocation6], 4294965232 }
  0x5c   :  { %631 = dma.done.wait [#allocation9], 32  }
  0x5d   :  { %632 = vsyncadd [#allocation9], 4294967264  ;;  %v465_v0 = vld [vmem:[#allocation5 + $0x40] sm:$0xff]   ;;  %v467_v2 = vld [vmem:[#allocation5 + $0x48] sm:$0xff]   ;;  %v308_v37 = vlaneseq  ;;  %s644_s4 = smov [#allocation11]  }
  0x5e   :  { %v466_v1 = vld [vmem:[#allocation5] sm:$0xff]   ;;  %411 = vmatprep.subr.bf16.mxu0 %v465_v0  ;;  %439 = vmatprep.subr.bf16.mxu1 %v465_v0  ;;  %v468_v3 = vld [vmem:[#allocation5 + $0x8] sm:$0xff]   ;;  %v469_v4 = vld [vmem:[#allocation5 + $0x50] sm:$0xff]   ;;  %s374_s6 = sshll.u32 %s644_s4, 4  ;;  %s375_s6 = int_to_ptr.vmem [resolvable:$true] %s374_s6 }
  0x5f   :  { %412 = vmatpush3.bf16.msra.mxu0 %v466_v1  ;;  %447 = vmatpush3.bf16.msra.mxu1 %v466_v1  ;;  %v470_v5 = vld [vmem:[#allocation5 + $0x10] sm:$0xff]   ;;  %v471_v6 = vld [vmem:[#allocation5 + $0x58] sm:$0xff]   ;;  %v473_v8 = vld [vmem:[#allocation5 + $0x60] sm:$0xff]   ;;  %v309_v38 = vand.u32 127, %v308_v37  ;;  %s605_s7 = scalar_lea.vmem %s375_s6, 512  ;;  %p610_p13 = scmp.lt.s32.totalorder %s375_s6, %s375_s6 }
  0x60   :  { %413 = vmatprep.subr.bf16.mxu0 %v467_v2  ;;  %440 = vmatprep.subr.bf16.mxu1 %v467_v2  ;;  %v472_v7 = vld [vmem:[#allocation5 + $0x18] sm:$0xff]   ;;  %v474_v9 = vld [vmem:[#allocation5 + $0x20] sm:$0xff]   ;;  %v475_v10 = vld [vmem:[#allocation5 + $0x68] sm:$0xff]   ;;  %p606_p12 = scmp.ne.s32.totalorder %s375_s6, %s605_s7  ;;  %p611_p0 = scmp.lt.s32.totalorder %s605_s7, %s605_s7 }
  0x61   :  { %v483_v11 = vld [vmem:[#allocation2 + $0x4] ss:$8 sps:$4 sm:$0xff]   ;;  %v486_v12 = vld [vmem:[#allocation2 + $0x14] ss:$8 sps:$4 sm:$0xff]   ;;  %v481_v18 = vld [vmem:[#allocation2] ss:$8 sps:$4 sm:$0xff]  }
  0x62   :  { %v476_v13 = vld [vmem:[#allocation5 + $0x28] sm:$0xff]   ;;  %v477_v14 = vld [vmem:[#allocation5 + $0x70] sm:$0xff]   ;;  %275 = vmatprep.mubr.bf16.mxu0 %v483_v11  ;;  %283 = vmatprep.mubr.bf16.mxu1 %v486_v12  ;;  %v479_v16 = vld [vmem:[#allocation5 + $0x78] sm:$0xff]   ;;  %vm310_vm0 = vcmp.lt.s32.totalorder %v309_v38, 64  ;;  %p612_p1 = por %p611_p0, %p610_p13 }
  0x63   :  { %414 = vmatpush3.bf16.msra.mxu0 %v468_v3  ;;  %448 = vmatpush3.bf16.msra.mxu1 %v468_v3  ;;  %v478_v15 = vld [vmem:[#allocation5 + $0x30] sm:$0xff]   ;;  %v480_v17 = vld [vmem:[#allocation5 + $0x38] sm:$0xff]   ;;  %v388_v24 = vld [vmem:[#allocation7] ss:$0 sm:$0xff] }
  0x64   :  { %415 = vmatprep.subr.bf16.mxu0 %v469_v4  ;;  %441 = vmatprep.subr.bf16.mxu1 %v469_v4  ;;  %v484_v19 = vld [vmem:[#allocation2 + $0x10] ss:$8 sps:$4 sm:$0xff]   ;;  %p613_p2 = pnand %p612_p1, %p606_p12 }
  0x67   :  { %416 = vmatpush3.bf16.msra.mxu0 %v470_v5  ;;  %449 = vmatpush3.bf16.msra.mxu1 %v470_v5 }
  0x68   :  { %417 = vmatprep.subr.bf16.mxu0 %v471_v6  ;;  %442 = vmatprep.subr.bf16.mxu1 %v471_v6 }
  0x6b   :  { %418 = vmatpush3.bf16.msra.mxu0 %v472_v7  ;;  %450 = vmatpush3.bf16.msra.mxu1 %v472_v7 }
  0x6c   :  { %419 = vmatprep.subr.bf16.mxu0 %v473_v8  ;;  %443 = vmatprep.subr.bf16.mxu1 %v473_v8  ;;  %v409_v8 = vld [vmem:[#allocation8] ss:$0 sm:$0xff] }
  0x6f   :  { %420 = vmatpush3.bf16.msra.mxu0 %v474_v9  ;;  %451 = vmatpush3.bf16.msra.mxu1 %v474_v9 }
  0x70   :  { %421 = vmatprep.subr.bf16.mxu0 %v475_v10  ;;  %444 = vmatprep.subr.bf16.mxu1 %v475_v10  ;;  %v410_v10 = vld [vmem:[#allocation10] ss:$0 sm:$0xff] }
  0x73   :  { %422 = vmatpush3.bf16.msra.mxu0 %v476_v13  ;;  %452 = vmatpush3.bf16.msra.mxu1 %v476_v13 }
  0x74   :  { %423 = vmatprep.subr.bf16.mxu0 %v477_v14  ;;  %445 = vmatprep.subr.bf16.mxu1 %v477_v14 }
  0x77   :  { %424 = vmatpush3.bf16.msra.mxu0 %v478_v15  ;;  %453 = vmatpush3.bf16.msra.mxu1 %v478_v15 }
  0x78   :  { %425 = vmatprep.subr.bf16.mxu0 %v479_v16  ;;  %446 = vmatprep.subr.bf16.mxu1 %v479_v16 }
  0x7b   :  { %426 = vmatpush3.bf16.msra.mxu0 %v480_v17  ;;  %454 = vmatpush3.bf16.msra.mxu1 %v480_v17 }
  0x7e   :  { %276 = vmatmul.mubr.bf16.vlgmr.msra.gmra.mrb[0].mxu0 %v481_v18  ;;  %284 = vmatmul.mubr.bf16.vlgmr.msra.gmra.mrb[0].mxu1 %v484_v19 }
 0x151   :  { %v427_v20 = vpop.f32.mrb[0].mxu0  ;;  %v433_v21 = vpop.f32.mrb[0].mxu1 }
 0x152   :  { %v428_v22 = vpop.f32.mrb[1].mxu0  ;;  %v434_v23 = vpop.f32.mrb[1].mxu1 }
 0x153   :  { %v429_v25 = vadd.f32 %v428_v22, %v427_v20  ;;  %v435_v26 = vadd.f32 %v434_v23, %v433_v21  ;;  %v430_v27 = vpop.f32.mrb[2].mxu0  ;;  %v436_v28 = vpop.f32.mrb[2].mxu1 }
 0x154   :  { %v431_v29 = vpop.f32.mrb[3].mxu0  ;;  %v437_v30 = vpop.f32.mrb[3].mxu1 }
 0x155   :  { %v432_v31 = vadd.f32 %v431_v29, %v430_v27  ;;  %v438_v32 = vadd.f32 %v437_v30, %v436_v28  ;;  %v286_v33 = vadd.f32 %v435_v26, %v388_v24  ;;  %v278_v34 = vadd.f32 %v429_v25, %v388_v24 }
 0x157   :  { %296 = vadd.xlane.f32.xlu1 %v286_v33  ;;  %292 = vadd.xlane.f32.xlu0 %v278_v34  ;;  %v289_v35 = vadd.f32 %v438_v32, %v388_v24  ;;  %v281_v36 = vadd.f32 %v432_v31, %v388_v24 }
 0x15b   :  { %298 = vadd.xlane.f32.xlu1 %v289_v35  ;;  %294 = vadd.xlane.f32.xlu0 %v281_v36 }
 0x1e4   :  { %v297_v39 = vpop.xlane.xlu1 %296  ;;  %v293_v40 = vpop.xlane.xlu0 %292 }
 0x1e5   :  { %v302_v41 = vmul.f32 0.015625, %v297_v39  ;;  %v300_v42 = vmul.f32 0.015625, %v293_v40 }
 0x1e7   :  { %v306_v43 = vsub.f32 %v286_v33, %v302_v41  ;;  %v304_v44 = vsub.f32 %v278_v34, %v300_v42 }
 0x1e8   :  { %v299_v45 = vpop.xlane.xlu1 %298  ;;  %v295_v46 = vpop.xlane.xlu0 %294 }
 0x1e9   :  { %v303_v47 = vmul.f32 0.015625, %v299_v45  ;;  %v301_v48 = vmul.f32 0.015625, %v295_v46  ;;  %v311_v49 = vsel %vm310_vm0, %v304_v44, 0.0  ;;  %v313_v53 = vsel %vm310_vm0, %v306_v43, 0.0 }
 0x1ea   :  { %v315_v50 = vmul.f32 %v311_v49, %v311_v49  ;;  %v317_v55 = vmul.f32 %v313_v53, %v313_v53 }
 0x1eb   :  { %v307_v51 = vsub.f32 %v289_v35, %v303_v47  ;;  %v305_v52 = vsub.f32 %v281_v36, %v301_v48 }
 0x1ec   :  { %319 = vadd.xlane.f32.xlu0 %v315_v50 }
 0x1ed   :  { %v312_v54 = vsel %vm310_vm0, %v305_v52, 0.0  ;;  %v314_v57 = vsel %vm310_vm0, %v307_v51, 0.0 }
 0x1ee   :  { %v316_v56 = vmul.f32 %v312_v54, %v312_v54  ;;  %v318_v58 = vmul.f32 %v314_v57, %v314_v57 }
 0x1f0   :  { %323 = vadd.xlane.f32.xlu0 %v317_v55  ;;  %321 = vadd.xlane.f32.xlu1 %v316_v56 }
 0x1f4   :  { %325 = vadd.xlane.f32.xlu1 %v318_v58 }
 0x279   :  { %v320_v59 = vpop.xlane.xlu0 %319 }
 0x27a   :  { %v327_v60 = vmul.f32 0.015625, %v320_v59 }
 0x27c   :  { %v331_v61 = vadd.f32 1e-05, %v327_v60 }
 0x27d   :  { %v322_v62 = vpop.xlane.xlu1 %321  ;;  %v324_v63 = vpop.xlane.xlu0 %323 }
 0x27e   :  { %487 = vrsqrt.f32 %v331_v61  ;;  %v328_v0 = vmul.f32 0.015625, %v322_v62  ;;  %v329_v1 = vmul.f32 0.015625, %v324_v63 }
 0x280   :  { %v332_v2 = vadd.f32 1e-05, %v328_v0  ;;  %v333_v3 = vadd.f32 1e-05, %v329_v1 }
 0x281   :  { %v326_v4 = vpop.xlane.xlu1 %325 }
 0x282   :  { %489 = vrsqrt.f32 %v332_v2  ;;  %v330_v5 = vmul.f32 0.015625, %v326_v4 }
 0x283   :  { %491 = vrsqrt.f32 %v333_v3 }
 0x284   :  { %v334_v6 = vadd.f32 1e-05, %v330_v5 }
 0x286   :  { %493 = vrsqrt.f32 %v334_v6 }
 0x288   :  { %v488_v7 = vpop.eup %487 }
 0x289   :  { %v339_v9 = vmul.f32 %v488_v7, %v311_v49 }
 0x28b   :  { %v350_v11 = vmul.f32 %v409_v8, %v339_v9 }
 0x28c   :  { %v490_v12 = vpop.eup %489 }
 0x28d   :  { %v492_v13 = vpop.eup %491  ;;  %v340_v14 = vmul.f32 %v490_v12, %v312_v54  ;;  %v361_v15 = vadd.f32 %v410_v10, %v350_v11 }
 0x28e   :  { %v341_v16 = vmul.f32 %v492_v13, %v313_v53 }
 0x28f   :  { %v351_v17 = vmul.f32 %v409_v8, %v340_v14  ;;  %365 = vst [vmem:[#allocation11] sm:$0xff] %v361_v15 }
 0x290   :  { %v494_v18 = vpop.eup %493  ;;  %v352_v19 = vmul.f32 %v409_v8, %v341_v16 }
 0x291   :  { %v342_v20 = vmul.f32 %v494_v18, %v314_v57  ;;  %v362_v21 = vadd.f32 %v410_v10, %v351_v17 }
 0x292   :  { %v363_v22 = vadd.f32 %v410_v10, %v352_v19 }
 0x293   :  { %v353_v23 = vmul.f32 %v409_v8, %v342_v20  ;;  %366 = vst [vmem:[#allocation11 + $0x8] sm:$0xff] %v362_v21 }
 0x294   :  { %367 = vst [vmem:[#allocation11 + $0x10] sm:$0xff] %v363_v22 }
 0x295   :  { %v364_v24 = vadd.f32 %v410_v10, %v353_v23 }
 0x297   :  { %368 = vst [vmem:[#allocation11 + $0x18] sm:$0xff] %v364_v24 }
 0x298   :  { %616 = shalt.err (!%p613_p2)
}
 0x299   :  { %s617_s11 = scalar_lea.hbm %s762_s5, 512 }
 0x29a   :  { %p618_p3 = scmp.ne.s32.totalorder %s762_s5, %s617_s11  ;;  %p621_p4 = scmp.lt.u32.totalorder %s617_s11, %s762_s5 }
 0x29c   :  { %p623_p5 = pnand %p621_p4, %p618_p3 }
 0x29e   :  { %626 = shalt.err (!%p623_p5)
}
 0x29f   :  { %380 = dma.vmem_to_hbm [thread:$0]  %s375_s6, 512, %s762_s5, [#allocation4], %s640_s3, %s640_s3, %s641_s29  }
 0x2a0   :  { %633 = dma.done.wait [#allocation4], 512  }
 0x2a1   :  { %634 = vsyncadd [#allocation4], 4294966784 }
 0x2a2   :  { %384 = vsyncpa [#allocation3], 1 }
 0x2a3   :  { %385 = vsyncpa [#allocation6], 1 }
 0x2a4   :  { %386 = vsyncpa [#allocation9], 1 }
 0x2a5   :  { %387 = vsyncpa [#allocation4], 1 }

</bundles_post_ra>
